<compile_context>
chip_gen: v7x
topology: tpu7x:2x2x1
jax: 0.10.0
libtpu: 0.0.40
codegen_flags: <defaults>
</compile_context>

<pallas_src>
import math

import jax
import jax.numpy as jnp
from jax.experimental import pallas as pl
from jax.experimental.pallas import tpu as pltpu


def _hardswish(x):
    # torch.nn.Hardswish: x * relu6(x + 3) / 6
    return x * jnp.clip(x + 3.0, 0.0, 6.0) * (1.0 / 6.0)


def fold_bn(gamma, beta, running_mean, running_var, eps=1e-5):
    scale = gamma / jnp.sqrt(running_var + eps)
    bias = beta - running_mean * scale
    return scale, bias


def resblock_forward(x_nchw, w1, s1, b1, wdw, s2, b2, w2, s3, b3):
    """ResBlock forward.

    x_nchw : (N, Cin, H, W)   w1 : (Ch, Cin)   wdw : (Ch, 3, 3)   w2 : (Cout, Ch)
    s*/b*  : folded eval-mode BN scale/bias per channel.
    Returns (N, Cout, H, W) float32.
    """
    N, Cin, H, W = x_nchw.shape
    Ch = w1.shape[0]
    Cout = w2.shape[0]
    assert Cin == Cout, "residual add requires in_features == out_features"
    HW = H * W
    L = N * HW                      # batch folded onto the lane axis

    # ---- host-side folding: BN scales + Hardswish 1/6 factors into weights ----
    # conv1 + bn1:          h_bn = (s1*w1) @ x + b1
    # hardswish #1 /6 and bn2 scale fold into the depthwise weights.
    # hardswish #2 /6 and bn3 scale fold into w2.
    w1f = (w1 * s1[:, None]).astype(jnp.float32)                                   # (Ch, Cin)
    wdwf = (wdw.reshape(Ch, 9) * (s2[:, None] * (1.0 / 6.0))).astype(jnp.float32)  # (Ch, 9)
    w2f = (w2 * s3[:, None] * (1.0 / 6.0)).astype(jnp.float32)                     # (Cout, Ch)

    # ---- pack all parameters into ONE array -> one input DMA ----
    R = max(Ch, Cout)
    c_w1 = 0                      # (Ch, Cin)   folded conv1 weights
    c_b1 = Cin                    # (Ch, 1)     bn1 bias
    c_dw = Cin + 1                # (Ch, 9)     folded depthwise weights
    c_b2 = Cin + 10               # (Ch, 1)     bn2 bias
    c_w2 = Cin + 11               # (Cout, Ch)  folded conv2 weights
    c_b3 = Cin + 11 + Ch          # (Cout, 1)   bn3 bias
    PC = Cin + 12 + Ch
    params = jnp.zeros((R, PC), jnp.float32)
    params = params.at[:Ch, c_w1:c_w1 + Cin].set(w1f)
    params = params.at[:Ch, c_b1].set(b1.astype(jnp.float32))
    params = params.at[:Ch, c_dw:c_dw + 9].set(wdwf)
    params = params.at[:Ch, c_b2].set(b2.astype(jnp.float32))
    params = params.at[:Cout, c_w2:c_w2 + Ch].set(w2f)
    params = params.at[:Cout, c_b3].set(b3.astype(jnp.float32))

    # Batch on lanes: (N, Cin, H, W) -> (Cin, N*HW).  Wrapper-side layout
    # plumbing (tiny XLA transpose) so the kernel sees a lane-dense slab.
    x_flat = jnp.transpose(x_nchw, (1, 0, 2, 3)).reshape(Cin, L).astype(jnp.float32)

    def kernel(x_ref, p_ref, o_ref):
        x = x_ref[...]                               # (Cin, L)
        P = p_ref[...]                               # (R, PC) — single param load
        w1v = P[:Ch, c_w1:c_w1 + Cin]                # (Ch, Cin)
        b1v = P[:Ch, c_b1:c_b1 + 1]                  # (Ch, 1)
        b2v = P[:Ch, c_b2:c_b2 + 1]                  # (Ch, 1)
        w2v = P[:Cout, c_w2:c_w2 + Ch]               # (Cout, Ch)
        b3v = P[:Cout, c_b3:c_b3 + 1]                # (Cout, 1)

        # conv1 (1x1) + BN1 (folded) -> 6*Hardswish (1/6 folded downstream).
        # (For much larger shapes, cast both operands to bf16 here on v6e/v7x;
        #  at these shapes the kernel is overhead-bound so f32 is kept.)
        h = jnp.dot(w1v, x, preferred_element_type=jnp.float32) + b1v
        h = h * jnp.clip(h + 3.0, 0.0, 6.0)          # (Ch, L)

        # 4 base boundary masks from the per-image position p_loc = p % HW.
        p = jax.lax.broadcasted_iota(jnp.int32, (1, L), 1)
        p_loc = p % HW
        col = p % W
        top_ok = p_loc >= W                          # y - 1 >= 0
        bot_ok = p_loc < (H - 1) * W                 # y + 1 <= H-1
        left_ok = col >= 1                           # x - 1 >= 0
        right_ok = col <= W - 2                      # x + 1 <= W-1

        # 3x3 depthwise conv (stride 1, pad 1) via lane rolls modulo L.
        # Center tap initializes the accumulator (no roll, no mask).
        acc = h * P[:Ch, c_dw + 4:c_dw + 5]
        for dy in (-1, 0, 1):
            for dx in (-1, 0, 1):
                if dy == 0 and dx == 0:
                    continue
                k = (dy + 1) * 3 + (dx + 1)
                off = dy * W + dx
                tapv = pltpu.roll(h, (-off) % L, axis=1)
                wk = P[:Ch, c_dw + k:c_dw + k + 1]
                conds = []
                if dy == -1:
                    conds.append(top_ok)
                elif dy == 1:
                    conds.append(bot_ok)
                if dx == -1:
                    conds.append(left_ok)
                elif dx == 1:
                    conds.append(right_ok)
                m = conds[0]
                for c in conds[1:]:
                    m = jnp.logical_and(m, c)
                # Masks computed from p % HW also zero any cross-image reads
                # introduced by rolling along the fused N*HW axis.
                acc = acc + jnp.where(m, tapv * wk, 0.0)

        # BN2 bias (scale already folded) -> 6*Hardswish (1/6 folded into w2)
        f = acc + b2v
        f = f * jnp.clip(f + 3.0, 0.0, 6.0)

        # conv2 (1x1) + BN3 (folded)
        out = jnp.dot(w2v, f, preferred_element_type=jnp.float32) + b3v

        # residual add (full-lane, unmasked stores: L = 4 x 128)
        o_ref[...] = x + out

    grid_spec = pltpu.PrefetchScalarGridSpec(
        num_scalar_prefetch=0,
        grid=(1,),
        in_specs=[
            pl.BlockSpec((Cin, L), lambda i: (0, 0)),   # activations
            pl.BlockSpec((R, PC), lambda i: (0, 0)),    # packed parameters
        ],
        out_specs=pl.BlockSpec((Cout, L), lambda i: (0, 0)),
    )

    out_flat = pl.pallas_call(
        kernel,
        out_shape=jax.ShapeDtypeStruct((Cout, L), jnp.float32),
        grid_spec=grid_spec,
        compiler_params=pltpu.CompilerParams(
            dimension_semantics=("arbitrary",)),
    )(x_flat, params)

    return jnp.transpose(out_flat.reshape(Cout, N, H, W), (1, 0, 2, 3))


def resblock_ref(x, w1, s1, b1, wdw, s2, b2, w2, s3, b3):
    """Pure-JAX reference in NCHW, unfolded eval-mode BN."""
    N, Cin, H, W = x.shape
    h = jnp.einsum('oc,nchw->nohw', w1, x, precision=jax.lax.Precision.HIGHEST)
    h = _hardswish(h * s1[None, :, None, None] + b1[None, :, None, None])
    hp = jnp.pad(h, ((0, 0), (0, 0), (1, 1), (1, 1)))
    acc = jnp.zeros_like(h)
    for ky in range(3):
        for kx in range(3):
            acc = acc + hp[:, :, ky:ky + H, kx:kx + W] * wdw[None, :, ky, kx, None, None]
    f = _hardswish(acc * s2[None, :, None, None] + b2[None, :, None, None])
    out = jnp.einsum('oc,nchw->nohw', w2, f, precision=jax.lax.Precision.HIGHEST)
    out = out * s3[None, :, None, None] + b3[None, :, None, None]
    return x + out


if __name__ == "__main__":
    # Module shapes: in_features = out_features = 8, hidden_features = 16.
    N, Cin, H, W = 2, 8, 16, 16
    Ch, Cout = 16, 8

    key = jax.random.PRNGKey(0)
    keys = jax.random.split(key, 8)

    # PyTorch-style NCHW input.
    x = jax.random.normal(keys[0], (N, Cin, H, W), jnp.float32)

    # Weight init mirroring ResBlock._init_weights std:
    #   conv1: sqrt(2/(1*1*Ch)), dwconv: sqrt(2/(3*3*Ch/Ch)), conv2: sqrt(2/(1*1*Cout))
    w1 = jax.random.normal(keys[1], (Ch, Cin), jnp.float32) * math.sqrt(2.0 / Ch)
    wdw = jax.random.normal(keys[2], (Ch, 3, 3), jnp.float32) * math.sqrt(2.0 / 9.0)
    w2 = jax.random.normal(keys[3], (Cout, Ch), jnp.float32) * math.sqrt(2.0 / Cout)

    # Eval-mode BatchNorm with non-trivial running stats (exercises the folding).
    def bn_params(k, C):
        k1, k2, k3, k4 = jax.random.split(k, 4)
        gamma = 1.0 + 0.1 * jax.random.normal(k1, (C,), jnp.float32)
        beta = 0.1 * jax.random.normal(k2, (C,), jnp.float32)
        mean = 0.1 * jax.random.normal(k3, (C,), jnp.float32)
        var = 1.0 + 0.1 * jax.random.uniform(k4, (C,), jnp.float32)
        return fold_bn(gamma, beta, mean, var)

    s1, b1 = bn_params(keys[4], Ch)    # conv1.bn
    s2, b2 = bn_params(keys[5], Ch)    # self.norm
    s3, b3 = bn_params(keys[6], Cout)  # conv2.bn

    out = resblock_forward(x, w1, s1, b1, wdw, s2, b2, w2, s3, b3)
    out = jax.block_until_ready(out)

    ref = resblock_ref(x, w1, s1, b1, wdw, s2, b2, w2, s3, b3)
    assert out.shape == (N, Cout, H, W)
    max_err = float(jnp.max(jnp.abs(out - ref)))
    assert jnp.allclose(out, ref, atol=2e-2, rtol=2e-2), \
        f"mismatch vs reference, max abs err {max_err}"

    print("KERNEL_OK")
</pallas_src>

<mosaic_0001>
module attributes {stable_mosaic.version = 11 : i64} {
  func.func @kernel(%arg0: i32, %arg1: memref<8x512xf32, #tpu.memory_space<vmem>>, %arg2: memref<16x36xf32, #tpu.memory_space<vmem>>, %arg3: memref<8x512xf32, #tpu.memory_space<vmem>>) attributes {dimension_semantics = [#tpu.dimension_semantics<arbitrary>], iteration_bounds = array<i64: 1>, scalar_prefetch = 0 : i64, scratch_operands = 0 : i64, tpu.core_type = #tpu.core_type<tc>, window_params = [{pipeline_mode = #tpu.pipeline_mode<synchronous>, transform_indices = @transform_0, window_bounds = array<i64: 8, 512>}, {pipeline_mode = #tpu.pipeline_mode<synchronous>, transform_indices = @transform_1, window_bounds = array<i64: 16, 36>}, {pipeline_mode = #tpu.pipeline_mode<synchronous>, transform_indices = @transform_2, window_bounds = array<i64: 8, 512>}]} {
    %c0 = arith.constant 0 : index
    %c0_0 = arith.constant 0 : index
    %0 = vector.load %arg1[%c0, %c0_0] : memref<8x512xf32, #tpu.memory_space<vmem>>, vector<8x512xf32>
    %c0_1 = arith.constant 0 : index
    %c0_2 = arith.constant 0 : index
    %1 = vector.load %arg2[%c0_1, %c0_2] : memref<16x36xf32, #tpu.memory_space<vmem>>, vector<16x36xf32>
    %2 = vector.extract_strided_slice %1 {offsets = [0, 0], sizes = [16, 8], strides = [1, 1]} : vector<16x36xf32> to vector<16x8xf32>
    %3 = vector.extract_strided_slice %1 {offsets = [0, 8], sizes = [16, 1], strides = [1, 1]} : vector<16x36xf32> to vector<16x1xf32>
    %4 = vector.extract_strided_slice %1 {offsets = [0, 18], sizes = [16, 1], strides = [1, 1]} : vector<16x36xf32> to vector<16x1xf32>
    %5 = vector.extract_strided_slice %1 {offsets = [0, 19], sizes = [8, 16], strides = [1, 1]} : vector<16x36xf32> to vector<8x16xf32>
    %6 = vector.extract_strided_slice %1 {offsets = [0, 35], sizes = [8, 1], strides = [1, 1]} : vector<16x36xf32> to vector<8x1xf32>
    %cst = arith.constant dense<0.000000e+00> : vector<16x512xf32>
    %7 = tpu.matmul %2, %0, %cst {dimension_numbers = #tpu.dot_dimension_numbers<[1], [0], [0], [1], [0, 0, 1, 1], [], []>} : vector<16x8xf32>, vector<8x512xf32>, vector<16x512xf32> -> vector<16x512xf32>
    %8 = vector.broadcast %3 : vector<16x1xf32> to vector<16x512xf32>
    %9 = arith.addf %7, %8 : vector<16x512xf32>
    %cst_3 = arith.constant 3.000000e+00 : f32
    %10 = vector.broadcast %cst_3 : f32 to vector<16x512xf32>
    %11 = arith.addf %9, %10 : vector<16x512xf32>
    %cst_4 = arith.constant 0.000000e+00 : f32
    %cst_5 = arith.constant 6.000000e+00 : f32
    %12 = vector.broadcast %cst_4 : f32 to vector<16x512xf32>
    %13 = arith.maximumf %12, %11 : vector<16x512xf32>
    %14 = vector.broadcast %cst_5 : f32 to vector<16x512xf32>
    %15 = arith.minimumf %14, %13 : vector<16x512xf32>
    %16 = arith.mulf %9, %15 : vector<16x512xf32>
    %17 = tpu.iota {dimensions = array<i32: 1>} : vector<1x512xi32>
    %c256_i32 = arith.constant 256 : i32
    %c0_i32 = arith.constant 0 : i32
    %18 = arith.cmpi eq, %c256_i32, %c0_i32 : i32
    %c1_i32 = arith.constant 1 : i32
    %19 = arith.select %18, %c1_i32, %c256_i32 : i32
    %20 = vector.broadcast %19 : i32 to vector<1x512xi32>
    %21 = arith.remsi %17, %20 : vector<1x512xi32>
    %c0_i32_6 = arith.constant 0 : i32
    %22 = vector.broadcast %c0_i32_6 : i32 to vector<1x512xi32>
    %23 = arith.cmpi ne, %21, %22 : vector<1x512xi32>
    %c0_i32_7 = arith.constant 0 : i32
    %24 = vector.broadcast %c0_i32_7 : i32 to vector<1x512xi32>
    %25 = arith.cmpi slt, %21, %24 : vector<1x512xi32>
    %c0_i32_8 = arith.constant 0 : i32
    %26 = arith.cmpi slt, %19, %c0_i32_8 : i32
    %27 = vector.broadcast %26 : i1 to vector<1x512xi1>
    %28 = vector.broadcast %27 : vector<1x512xi1> to vector<1x512xi1>
    %29 = arith.xori %25, %28 : vector<1x512xi1>
    %30 = arith.andi %29, %23 : vector<1x512xi1>
    %31 = vector.broadcast %19 : i32 to vector<1x512xi32>
    %32 = arith.addi %21, %31 : vector<1x512xi32>
    %33 = arith.select %30, %32, %21 : vector<1x512xi1>, vector<1x512xi32>
    %c16_i32 = arith.constant 16 : i32
    %c0_i32_9 = arith.constant 0 : i32
    %34 = arith.cmpi eq, %c16_i32, %c0_i32_9 : i32
    %c1_i32_10 = arith.constant 1 : i32
    %35 = arith.select %34, %c1_i32_10, %c16_i32 : i32
    %36 = vector.broadcast %35 : i32 to vector<1x512xi32>
    %37 = arith.remsi %17, %36 : vector<1x512xi32>
    %c0_i32_11 = arith.constant 0 : i32
    %38 = vector.broadcast %c0_i32_11 : i32 to vector<1x512xi32>
    %39 = arith.cmpi ne, %37, %38 : vector<1x512xi32>
    %c0_i32_12 = arith.constant 0 : i32
    %40 = vector.broadcast %c0_i32_12 : i32 to vector<1x512xi32>
    %41 = arith.cmpi slt, %37, %40 : vector<1x512xi32>
    %c0_i32_13 = arith.constant 0 : i32
    %42 = arith.cmpi slt, %35, %c0_i32_13 : i32
    %43 = vector.broadcast %42 : i1 to vector<1x512xi1>
    %44 = vector.broadcast %43 : vector<1x512xi1> to vector<1x512xi1>
    %45 = arith.xori %41, %44 : vector<1x512xi1>
    %46 = arith.andi %45, %39 : vector<1x512xi1>
    %47 = vector.broadcast %35 : i32 to vector<1x512xi32>
    %48 = arith.addi %37, %47 : vector<1x512xi32>
    %49 = arith.select %46, %48, %37 : vector<1x512xi1>, vector<1x512xi32>
    %c16_i32_14 = arith.constant 16 : i32
    %50 = vector.broadcast %c16_i32_14 : i32 to vector<1x512xi32>
    %51 = arith.cmpi sge, %33, %50 : vector<1x512xi32>
    %c240_i32 = arith.constant 240 : i32
    %52 = vector.broadcast %c240_i32 : i32 to vector<1x512xi32>
    %53 = arith.cmpi slt, %33, %52 : vector<1x512xi32>
    %c1_i32_15 = arith.constant 1 : i32
    %54 = vector.broadcast %c1_i32_15 : i32 to vector<1x512xi32>
    %55 = arith.cmpi sge, %49, %54 : vector<1x512xi32>
    %c14_i32 = arith.constant 14 : i32
    %56 = vector.broadcast %c14_i32 : i32 to vector<1x512xi32>
    %57 = arith.cmpi sle, %49, %56 : vector<1x512xi32>
    %58 = vector.extract_strided_slice %1 {offsets = [0, 13], sizes = [16, 1], strides = [1, 1]} : vector<16x36xf32> to vector<16x1xf32>
    %59 = vector.broadcast %58 : vector<16x1xf32> to vector<16x512xf32>
    %60 = arith.mulf %16, %59 : vector<16x512xf32>
    %c17_i32 = arith.constant 17 : i32
    %61 = tpu.dynamic_rotate %16 by %c17_i32 dim 1 : vector<16x512xf32>, i32 -> vector<16x512xf32>
    %62 = vector.extract_strided_slice %1 {offsets = [0, 9], sizes = [16, 1], strides = [1, 1]} : vector<16x36xf32> to vector<16x1xf32>
    %63 = arith.andi %51, %55 : vector<1x512xi1>
    %64 = vector.broadcast %62 : vector<16x1xf32> to vector<16x512xf32>
    %65 = arith.mulf %61, %64 : vector<16x512xf32>
    %cst_16 = arith.constant 0.000000e+00 : f32
    %66 = vector.shape_cast %63 : vector<1x512xi1> to vector<1x512xi1>
    %67 = vector.broadcast %66 : vector<1x512xi1> to vector<16x512xi1>
    %68 = vector.broadcast %cst_16 : f32 to vector<16x512xf32>
    %69 = arith.select %67, %65, %68 : vector<16x512xi1>, vector<16x512xf32>
    %70 = arith.addf %60, %69 : vector<16x512xf32>
    %c16_i32_17 = arith.constant 16 : i32
    %71 = tpu.dynamic_rotate %16 by %c16_i32_17 dim 1 : vector<16x512xf32>, i32 -> vector<16x512xf32>
    %72 = vector.extract_strided_slice %1 {offsets = [0, 10], sizes = [16, 1], strides = [1, 1]} : vector<16x36xf32> to vector<16x1xf32>
    %73 = vector.broadcast %72 : vector<16x1xf32> to vector<16x512xf32>
    %74 = arith.mulf %71, %73 : vector<16x512xf32>
    %cst_18 = arith.constant 0.000000e+00 : f32
    %75 = vector.shape_cast %51 : vector<1x512xi1> to vector<1x512xi1>
    %76 = vector.broadcast %75 : vector<1x512xi1> to vector<16x512xi1>
    %77 = vector.broadcast %cst_18 : f32 to vector<16x512xf32>
    %78 = arith.select %76, %74, %77 : vector<16x512xi1>, vector<16x512xf32>
    %79 = arith.addf %70, %78 : vector<16x512xf32>
    %c15_i32 = arith.constant 15 : i32
    %80 = tpu.dynamic_rotate %16 by %c15_i32 dim 1 : vector<16x512xf32>, i32 -> vector<16x512xf32>
    %81 = vector.extract_strided_slice %1 {offsets = [0, 11], sizes = [16, 1], strides = [1, 1]} : vector<16x36xf32> to vector<16x1xf32>
    %82 = arith.andi %51, %57 : vector<1x512xi1>
    %83 = vector.broadcast %81 : vector<16x1xf32> to vector<16x512xf32>
    %84 = arith.mulf %80, %83 : vector<16x512xf32>
    %cst_19 = arith.constant 0.000000e+00 : f32
    %85 = vector.shape_cast %82 : vector<1x512xi1> to vector<1x512xi1>
    %86 = vector.broadcast %85 : vector<1x512xi1> to vector<16x512xi1>
    %87 = vector.broadcast %cst_19 : f32 to vector<16x512xf32>
    %88 = arith.select %86, %84, %87 : vector<16x512xi1>, vector<16x512xf32>
    %89 = arith.addf %79, %88 : vector<16x512xf32>
    %c1_i32_20 = arith.constant 1 : i32
    %90 = tpu.dynamic_rotate %16 by %c1_i32_20 dim 1 : vector<16x512xf32>, i32 -> vector<16x512xf32>
    %91 = vector.extract_strided_slice %1 {offsets = [0, 12], sizes = [16, 1], strides = [1, 1]} : vector<16x36xf32> to vector<16x1xf32>
    %92 = vector.broadcast %91 : vector<16x1xf32> to vector<16x512xf32>
    %93 = arith.mulf %90, %92 : vector<16x512xf32>
    %cst_21 = arith.constant 0.000000e+00 : f32
    %94 = vector.shape_cast %55 : vector<1x512xi1> to vector<1x512xi1>
    %95 = vector.broadcast %94 : vector<1x512xi1> to vector<16x512xi1>
    %96 = vector.broadcast %cst_21 : f32 to vector<16x512xf32>
    %97 = arith.select %95, %93, %96 : vector<16x512xi1>, vector<16x512xf32>
    %98 = arith.addf %89, %97 : vector<16x512xf32>
    %c511_i32 = arith.constant 511 : i32
    %99 = tpu.dynamic_rotate %16 by %c511_i32 dim 1 : vector<16x512xf32>, i32 -> vector<16x512xf32>
    %100 = vector.extract_strided_slice %1 {offsets = [0, 14], sizes = [16, 1], strides = [1, 1]} : vector<16x36xf32> to vector<16x1xf32>
    %101 = vector.broadcast %100 : vector<16x1xf32> to vector<16x512xf32>
    %102 = arith.mulf %99, %101 : vector<16x512xf32>
    %cst_22 = arith.constant 0.000000e+00 : f32
    %103 = vector.shape_cast %57 : vector<1x512xi1> to vector<1x512xi1>
    %104 = vector.broadcast %103 : vector<1x512xi1> to vector<16x512xi1>
    %105 = vector.broadcast %cst_22 : f32 to vector<16x512xf32>
    %106 = arith.select %104, %102, %105 : vector<16x512xi1>, vector<16x512xf32>
    %107 = arith.addf %98, %106 : vector<16x512xf32>
    %c497_i32 = arith.constant 497 : i32
    %108 = tpu.dynamic_rotate %16 by %c497_i32 dim 1 : vector<16x512xf32>, i32 -> vector<16x512xf32>
    %109 = vector.extract_strided_slice %1 {offsets = [0, 15], sizes = [16, 1], strides = [1, 1]} : vector<16x36xf32> to vector<16x1xf32>
    %110 = arith.andi %53, %55 : vector<1x512xi1>
    %111 = vector.broadcast %109 : vector<16x1xf32> to vector<16x512xf32>
    %112 = arith.mulf %108, %111 : vector<16x512xf32>
    %cst_23 = arith.constant 0.000000e+00 : f32
    %113 = vector.shape_cast %110 : vector<1x512xi1> to vector<1x512xi1>
    %114 = vector.broadcast %113 : vector<1x512xi1> to vector<16x512xi1>
    %115 = vector.broadcast %cst_23 : f32 to vector<16x512xf32>
    %116 = arith.select %114, %112, %115 : vector<16x512xi1>, vector<16x512xf32>
    %117 = arith.addf %107, %116 : vector<16x512xf32>
    %c496_i32 = arith.constant 496 : i32
    %118 = tpu.dynamic_rotate %16 by %c496_i32 dim 1 : vector<16x512xf32>, i32 -> vector<16x512xf32>
    %119 = vector.extract_strided_slice %1 {offsets = [0, 16], sizes = [16, 1], strides = [1, 1]} : vector<16x36xf32> to vector<16x1xf32>
    %120 = vector.broadcast %119 : vector<16x1xf32> to vector<16x512xf32>
    %121 = arith.mulf %118, %120 : vector<16x512xf32>
    %cst_24 = arith.constant 0.000000e+00 : f32
    %122 = vector.shape_cast %53 : vector<1x512xi1> to vector<1x512xi1>
    %123 = vector.broadcast %122 : vector<1x512xi1> to vector<16x512xi1>
    %124 = vector.broadcast %cst_24 : f32 to vector<16x512xf32>
    %125 = arith.select %123, %121, %124 : vector<16x512xi1>, vector<16x512xf32>
    %126 = arith.addf %117, %125 : vector<16x512xf32>
    %c495_i32 = arith.constant 495 : i32
    %127 = tpu.dynamic_rotate %16 by %c495_i32 dim 1 : vector<16x512xf32>, i32 -> vector<16x512xf32>
    %128 = vector.extract_strided_slice %1 {offsets = [0, 17], sizes = [16, 1], strides = [1, 1]} : vector<16x36xf32> to vector<16x1xf32>
    %129 = arith.andi %53, %57 : vector<1x512xi1>
    %130 = vector.broadcast %128 : vector<16x1xf32> to vector<16x512xf32>
    %131 = arith.mulf %127, %130 : vector<16x512xf32>
    %cst_25 = arith.constant 0.000000e+00 : f32
    %132 = vector.shape_cast %129 : vector<1x512xi1> to vector<1x512xi1>
    %133 = vector.broadcast %132 : vector<1x512xi1> to vector<16x512xi1>
    %134 = vector.broadcast %cst_25 : f32 to vector<16x512xf32>
    %135 = arith.select %133, %131, %134 : vector<16x512xi1>, vector<16x512xf32>
    %136 = arith.addf %126, %135 : vector<16x512xf32>
    %137 = vector.broadcast %4 : vector<16x1xf32> to vector<16x512xf32>
    %138 = arith.addf %136, %137 : vector<16x512xf32>
    %cst_26 = arith.constant 3.000000e+00 : f32
    %139 = vector.broadcast %cst_26 : f32 to vector<16x512xf32>
    %140 = arith.addf %138, %139 : vector<16x512xf32>
    %cst_27 = arith.constant 0.000000e+00 : f32
    %cst_28 = arith.constant 6.000000e+00 : f32
    %141 = vector.broadcast %cst_27 : f32 to vector<16x512xf32>
    %142 = arith.maximumf %141, %140 : vector<16x512xf32>
    %143 = vector.broadcast %cst_28 : f32 to vector<16x512xf32>
    %144 = arith.minimumf %143, %142 : vector<16x512xf32>
    %145 = arith.mulf %138, %144 : vector<16x512xf32>
    %cst_29 = arith.constant dense<0.000000e+00> : vector<8x512xf32>
    %146 = tpu.matmul %5, %145, %cst_29 {dimension_numbers = #tpu.dot_dimension_numbers<[1], [0], [0], [1], [0, 0, 1, 1], [], []>} : vector<8x16xf32>, vector<16x512xf32>, vector<8x512xf32> -> vector<8x512xf32>
    %147 = vector.broadcast %6 : vector<8x1xf32> to vector<8x512xf32>
    %148 = arith.addf %146, %147 : vector<8x512xf32>
    %149 = arith.addf %0, %148 : vector<8x512xf32>
    %c0_30 = arith.constant 0 : index
    %c0_31 = arith.constant 0 : index
    %150 = vector.load %arg3[%c0_30, %c0_31] : memref<8x512xf32, #tpu.memory_space<vmem>>, vector<8x512xf32>
    tpu.vector_store %arg3[%c0_30, %c0_31], %149 {strides = array<i32>} : memref<8x512xf32, #tpu.memory_space<vmem>>, vector<8x512xf32>,
    return
  }
  func.func @transform_0(%arg0: i32) -> (i32, i32) {
    %c0_i32 = arith.constant 0 : i32
    %c0_i32_0 = arith.constant 0 : i32
    %c0_i32_1 = arith.constant 0 : i32
    return %c0_i32, %c0_i32_0 : i32, i32
  }
  func.func @transform_1(%arg0: i32) -> (i32, i32) {
    %c0_i32 = arith.constant 0 : i32
    %c0_i32_0 = arith.constant 0 : i32
    %c0_i32_1 = arith.constant 0 : i32
    return %c0_i32, %c0_i32_0 : i32, i32
  }
  func.func @transform_2(%arg0: i32) -> (i32, i32) {
    %c0_i32 = arith.constant 0 : i32
    %c0_i32_0 = arith.constant 0 : i32
    %c0_i32_1 = arith.constant 0 : i32
    return %c0_i32, %c0_i32_0 : i32, i32
  }
}

</mosaic_0001>

<bundles_post_ra>
// kernel: tpu_custom_call.1
= control target key start
LH: loop header
LB: loop body
LE: loop exit
PB: predicated region body
PF: predicated region fallthrough
CT: control target
= control target key end

     0   :  { %7 = vsyncpa [#allocation3], 0  ;;  %s2232_s0 = inlined_call_operand.hbm [shape: f32[8,512], index: 0, kind: input, shape index: {}]   ;;  %s2233_s1 = inlined_call_operand.hbm [shape: f32[16,36], index: 1, kind: input, shape index: {}]   ;;  %s2234_s2 = inlined_call_operand.hbm [shape: f32[8,512], index: 2, kind: output, shape index: {}]  }
   0x1   :  { %8 = vsyncpa [#allocation6], 0 }
   0x2   :  { %9 = vsyncpa [#allocation4], 0  ;;  %s1275_s9 = smov [#allocation2]   ;;  %s1276_s11 = smov [#allocation5]  }
   0x3   :  { %s16_s10 = sshll.u32 %s1275_s9, 4  ;;  %s25_s12 = sshll.u32 %s1276_s11, 4  ;;  %s17_s10 = int_to_ptr.vmem [resolvable:$true] %s16_s10  ;;  %s1317_s12 = int_to_ptr.vmem [resolvable:$true] %s25_s12 }
   0x4   :  { %s1203_s15 = scalar_lea.hbm %s2232_s0, 512 }
   0x5   :  { %p1204_p0 = scmp.ne.s32.totalorder %s2232_s0, %s1203_s15  ;;  %p1207_p1 = scmp.lt.u32.totalorder %s1203_s15, %s2232_s0 }
   0x7   :  { %p1209_p2 = pnand %p1207_p1, %p1204_p0 }
   0x9   :  { %1212 = shalt.err (!%p1209_p2)
}
   0xa   :  { %s1213_s20 = scalar_lea.vmem %s17_s10, 512  ;;  %p1218_p4 = scmp.lt.s32.totalorder %s17_s10, %s17_s10 }
   0xb   :  { %p1214_p3 = scmp.ne.s32.totalorder %s17_s10, %s1213_s20  ;;  %p1219_p5 = scmp.lt.s32.totalorder %s1213_s20, %s1213_s20 }
   0xd   :  { %p1220_p6 = por %p1219_p5, %p1218_p4 }
   0xf   :  { %p1221_p7 = pnand %p1220_p6, %p1214_p3 }
  0x11   :  { %1224 = shalt.err (!%p1221_p7)
}
  0x12   :  { %19 = dma.hbm_to_vmem [thread:$0]  %s2232_s0, 512, %s17_s10, [#allocation3]  }
  0x13   :  { %s1225_s25 = scalar_lea.hbm %s2233_s1, 256 }
  0x14   :  { %p1226_p8 = scmp.ne.s32.totalorder %s2233_s1, %s1225_s25  ;;  %p1229_p9 = scmp.lt.u32.totalorder %s1225_s25, %s2233_s1 }
  0x16   :  { %p1231_p10 = pnand %p1229_p9, %p1226_p8 }
  0x18   :  { %1234 = shalt.err (!%p1231_p10)
}
  0x19   :  { %s1235_s30 = scalar_lea.vmem %s1317_s12, 256  ;;  %p1240_p12 = scmp.lt.s32.totalorder %s1317_s12, %s1317_s12 }
  0x1a   :  { %p1236_p11 = scmp.ne.s32.totalorder %s1317_s12, %s1235_s30  ;;  %p1241_p13 = scmp.lt.s32.totalorder %s1235_s30, %s1235_s30 }
  0x1c   :  { %p1242_p0 = por %p1241_p13, %p1240_p12 }
  0x1e   :  { %p1243_p1 = pnand %p1242_p0, %p1236_p11 }
  0x20   :  { %1246 = shalt.err (!%p1243_p1)
}
  0x21   :  { %s1277_s0 = smov 128   ;;  %s1278_s3 = smov 8  }
  0x22   :  { %31 = dma.hbm_to_vmem [thread:$0]  %s2233_s1, 256, %s1317_s12, [#allocation6], %s1277_s0, %s1277_s0, %s1278_s3  }
  0x23   :  { %1269 = dma.done.wait [#allocation3], 512  }
  0x24   :  { %1270 = vsyncadd [#allocation3], 4294966784 }
  0x25   :  { %1271 = dma.done.wait [#allocation6], 256  }
  0x26   :  { %1272 = vsyncadd [#allocation6], 4294967040  ;;  %v1279_v0 = vmov 0.0   ;;  %v1280_v1 = vmov 8   ;;  %v1281_v2 = vmov 9   ;;  %v39_v3 = vld [vmem:[#allocation2 + $0x8] sm:$0xff] }
  0x27   :  { %123 = vmatprep.mubr.f32.mxu0 %v1279_v0  ;;  %200 = vmatprep.mubr.f32.mxu1 %v1279_v0  ;;  %v41_v4 = vld [vmem:[#allocation2 + $0x18] sm:$0xff]  ;;  %v38_v5 = vld [vmem:[#allocation2] sm:$0xff]  ;;  %vm54_vm0 = vcmask 64512   ;;  %v40_v6 = vld [vmem:[#allocation2 + $0x10] sm:$0xff]  ;;  %v1282_v9 = vmov 13   ;;  %v1283_v10 = vmov 10  }
  0x28   :  { %1178 = vset.pattern.permute.xlu0 %v1280_v1  ;;  %1179 = vset.pattern.permute.xlu1 %v1281_v2  ;;  %v1348_v7 = vld [vmem:[#allocation5] sm:$0xff]  ;;  %v43_v8 = vld [vmem:[#allocation5 + $0x8] sm:$0xff]  ;;  %v1284_v11 = vmov 11   ;;  %v1285_v12 = vmov 12   ;;  %v1286_v13 = vmov 14   ;;  %v1287_v14 = vmov 15  }
  0x29   :  { %59 = vmatprep.subr.mxu0 %v39_v3  ;;  %136 = vmatprep.subr.mxu1 %v41_v4  ;;  %v1288_v15 = vmov 16   ;;  %v1289_v16 = vmov 17   ;;  %v1290_v17 = vmov 18   ;;  %s1291_s1 = smov 16   ;;  %s1292_s6 = smov 17  }
  0x2a   :  { %60 = vmatpush1.msra.mxu0 %v38_v5  ;;  %137 = vmatpush1.msra.mxu1 %v40_v6  ;;  %s1293_s7 = smov 1   ;;  %s1294_s8 = smov 127  }
  0x2b   :  { %1137 = vmatmul.mubr.msk.f32.vlgmr.msra.gmra.mrb[0].mxu0 %vm54_vm0, %v1348_v7  ;;  %1139 = vmatmul.mubr.msk.f32.vlgmr.msra.gmra.mrb[0].mxu1 %vm54_vm0, %v1348_v7  ;;  %s1295_s9 = smov 15   ;;  %s1296_s10 = smov 113  }
  0x2c   :  { %129 = vmatprep.mubr.f32.mxu0 %v1279_v0  ;;  %206 = vmatprep.mubr.f32.mxu1 %v1279_v0  ;;  %s1297_s11 = smov 112   ;;  %s1298_s12 = smov 111  }
  0x2d   :  { %46 = vperm.xlu0 %1178, %v1348_v7   ;;  %408 = vperm.xlu1 %1179, %v1348_v7   ;;  %s1299_s13 = smov 109   ;;  %s1301_s14 = smov [#allocation7]  }
  0x2e   :  { %s1127_s15 = sshll.u32 %s1301_s14, 4  ;;  %s1128_s15 = int_to_ptr.vmem [resolvable:$true] %s1127_s15 }
  0x2f   :  { %1138 = vmatmul.mubr.msk.f32.gmra.mrb[2].mxu0 %vm54_vm0, %v43_v8  ;;  %1140 = vmatmul.mubr.msk.f32.gmra.mrb[2].mxu1 %vm54_vm0, %v43_v8  ;;  %s1247_s16 = scalar_lea.vmem %s1128_s15, 512  ;;  %p1252_p3 = scmp.lt.s32.totalorder %s1128_s15, %s1128_s15 }
  0x30   :  { %1035 = vmatprep.mubr.f32.mxu0 %v1279_v0  ;;  %1106 = vmatprep.mubr.f32.mxu1 %v1279_v0  ;;  %p1248_p2 = scmp.ne.s32.totalorder %s1128_s15, %s1247_s16  ;;  %p1253_p4 = scmp.lt.s32.totalorder %s1247_s16, %s1247_s16 }
  0x31   :  { %51 = vperm.xlu0 %1178, %v43_v8   ;;  %412 = vperm.xlu1 %1179, %v43_v8  }
  0x32   :  { %p1254_p5 = por %p1253_p4, %p1252_p3 }
  0x34   :  { %p1255_p6 = pnand %p1254_p5, %p1248_p2 }
  0x35   :  { %1180 = vset.pattern.permute.xlu0 %v1282_v9  ;;  %1181 = vset.pattern.permute.xlu1 %v1282_v9 }
  0x36   :  { %363 = vperm.xlu0 %1180, %v1348_v7   ;;  %367 = vperm.xlu1 %1181, %v43_v8  }
  0x3a   :  { %1182 = vset.pattern.permute.xlu1 %v1283_v10  ;;  %1183 = vset.pattern.permute.xlu0 %v1283_v10 }
  0x3b   :  { %473 = vperm.xlu1 %1182, %v1348_v7   ;;  %477 = vperm.xlu0 %1183, %v43_v8  }
  0x3f   :  { %1184 = vset.pattern.permute.xlu1 %v1284_v11  ;;  %1185 = vset.pattern.permute.xlu0 %v1285_v12 }
  0x40   :  { %542 = vperm.xlu1 %1184, %v1348_v7   ;;  %607 = vperm.xlu0 %1185, %v1348_v7  }
  0x44   :  { %546 = vperm.xlu1 %1184, %v43_v8   ;;  %1188 = vset.pattern.permute.xlu0 %v1286_v13 }
  0x45   :  { %676 = vperm.xlu0 %1188, %v43_v8  }
  0x48   :  { %1186 = vset.pattern.permute.xlu1 %v1285_v12 }
  0x49   :  { %611 = vperm.xlu1 %1186, %v43_v8   ;;  %1189 = vset.pattern.permute.xlu0 %v1287_v14 }
  0x4a   :  { %741 = vperm.xlu0 %1189, %v1348_v7  }
  0x4d   :  { %1187 = vset.pattern.permute.xlu1 %v1286_v13 }
  0x4e   :  { %672 = vperm.xlu1 %1187, %v1348_v7   ;;  %1192 = vset.pattern.permute.xlu0 %v1288_v15 }
  0x4f   :  { %810 = vperm.xlu0 %1192, %v43_v8  }
  0x52   :  { %1190 = vset.pattern.permute.xlu1 %v1287_v14 }
  0x53   :  { %745 = vperm.xlu1 %1190, %v43_v8   ;;  %1193 = vset.pattern.permute.xlu0 %v1289_v16 }
  0x54   :  { %875 = vperm.xlu0 %1193, %v1348_v7  }
  0x57   :  { %1191 = vset.pattern.permute.xlu1 %v1288_v15 }
  0x58   :  { %806 = vperm.xlu1 %1191, %v1348_v7   ;;  %1196 = vset.pattern.permute.xlu0 %v1290_v17 }
  0x59   :  { %919 = vperm.xlu0 %1196, %v43_v8  }
  0x5c   :  { %1194 = vset.pattern.permute.xlu1 %v1289_v16 }
  0x5d   :  { %879 = vperm.xlu1 %1194, %v43_v8  }
  0x61   :  { %1195 = vset.pattern.permute.xlu1 %v1290_v17 }
  0x62   :  { %915 = vperm.xlu1 %1195, %v1348_v7  }
  0xac   :  { %v47_v18 = vpop.permute.xlu0 %46  ;;  %v1411_v55 = vpop.permute.xlu1 %408 }
  0xb0   :  { %v1363_v26 = vpop.permute.xlu0 %51  ;;  %v1417_v58 = vpop.permute.xlu1 %412 }
  0xb5   :  { %v1369_v40 = vpop.permute.xlu0 %363  ;;  %v1427_v63 = vpop.permute.xlu1 %367 }
  0xba   :  { %v1434_v1 = vpop.permute.xlu1 %473  ;;  %v1452_v4 = vpop.permute.xlu0 %477 }
  0xbf   :  { %v1444_v2 = vpop.permute.xlu1 %542  ;;  %v1464_v12 = vpop.permute.xlu0 %607 }
  0xc3   :  { %v1456_v8 = vpop.permute.xlu1 %546 }
  0xc4   :  { %v1476_v16 = vpop.permute.xlu0 %676 }
  0xc8   :  { %v1462_v11 = vpop.permute.xlu1 %611 }
  0xcd   :  { %v1474_v15 = vpop.permute.xlu1 %672 }
  0xfe   :  { %v125_v19 = vpop.f32.mrb[0].mxu0  ;;  %v202_v20 = vpop.f32.mrb[0].mxu1 }
  0xff   :  { %v126_v21 = vadd.f32 %v125_v19, %v47_v18  ;;  %v203_v22 = vadd.f32 %v202_v20, %v47_v18  ;;  %v127_v23 = vpop.f32.mrb[1].mxu0  ;;  %v204_v24 = vpop.f32.mrb[1].mxu1 }
 0x100   :  { %v128_v25 = vadd.f32 %v127_v23, %v47_v18  ;;  %v205_v47 = vadd.f32 %v204_v24, %v47_v18  ;;  %v1486_v20 = vpop.permute.xlu1 %745 }
 0x101   :  { %v213_v27 = vadd.f32 3.0, %v126_v21  ;;  %v215_v28 = vadd.f32 3.0, %v203_v22 }
 0x102   :  { %v214_v29 = vadd.f32 3.0, %v128_v25  ;;  %v131_v30 = vpop.f32.mrb[2].mxu0  ;;  %v208_v31 = vpop.f32.mrb[2].mxu1  ;;  %v216_v48 = vadd.f32 3.0, %v205_v47 }
 0x103   :  { %v221_v32 = vmax.f32 %v213_v27, 0.0  ;;  %v223_v33 = vmax.f32 %v215_v28, 0.0  ;;  %v1365_v34 = vpop.f32.mrb[3].mxu0  ;;  %v1367_v35 = vpop.f32.mrb[3].mxu1  ;;  %v132_v52 = vadd.f32 %v131_v30, %v1363_v26  ;;  %v209_v54 = vadd.f32 %v208_v31, %v1363_v26 }
 0x104   :  { %v222_v36 = vmax.f32 %v214_v29, 0.0  ;;  %v224_v49 = vmax.f32 %v216_v48, 0.0  ;;  %v134_v3 = vadd.f32 %v1365_v34, %v1363_v26  ;;  %v211_v6 = vadd.f32 %v1367_v35, %v1363_v26 }
 0x105   :  { %v229_v37 = vmin.f32 %v221_v32, 6.0  ;;  %v231_v38 = vmin.f32 %v223_v33, 6.0  ;;  %v217_v53 = vadd.f32 3.0, %v132_v52  ;;  %v219_v57 = vadd.f32 3.0, %v209_v54 }
 0x106   :  { %v230_v39 = vmin.f32 %v222_v36, 6.0  ;;  %v232_v50 = vmin.f32 %v224_v49, 6.0  ;;  %v218_v5 = vadd.f32 3.0, %v134_v3  ;;  %v220_v10 = vadd.f32 3.0, %v211_v6 }
 0x107   :  { %v237_v41 = vmul.f32 %v229_v37, %v126_v21  ;;  %v239_v42 = vmul.f32 %v231_v38, %v203_v22  ;;  %v225_v56 = vmax.f32 %v217_v53, 0.0  ;;  %v227_v60 = vmax.f32 %v219_v57, 0.0  ;;  %v1488_v21 = vpop.permute.xlu0 %741  ;;  %v1498_v22 = vpop.permute.xlu1 %806 }
 0x108   :  { %v238_v43 = vmul.f32 %v230_v39, %v128_v25  ;;  %v1396_v51 = vmul.f32 %v232_v50, %v205_v47  ;;  %v226_v9 = vmax.f32 %v218_v5, 0.0  ;;  %v228_v14 = vmax.f32 %v220_v10, 0.0 }
 0x109   :  { %v1372_v44 = vmul.f32 %v1369_v40, %v237_v41  ;;  %v1375_v45 = vmul.f32 %v1369_v40, %v239_v42  ;;  %447 = vrot.lane.b32.xlu1 %v237_v41, %s1291_s1  ;;  %378 = vrot.lane.b32.xlu0 %v237_v41, %s1292_s6  ;;  %v233_v59 = vmin.f32 %v225_v56, 6.0  ;;  %v235_v62 = vmin.f32 %v227_v60, 6.0 }
 0x10a   :  { %v1380_v46 = vmul.f32 %v1369_v40, %v238_v43  ;;  %v234_v13 = vmin.f32 %v226_v9, 6.0  ;;  %v236_v18 = vmin.f32 %v228_v14, 6.0  ;;  %v245_v34 = vlaneseq }
 0x10b   :  { %v1425_v61 = vmul.f32 %v233_v59, %v132_v52  ;;  %v1432_v0 = vmul.f32 %v235_v62, %v209_v54  ;;  %v1500_v23 = vpop.permute.xlu0 %810  ;;  %v1506_v24 = vpop.permute.xlu1 %879 }
 0x10c   :  { %v1478_v17 = vmul.f32 %v234_v13, %v134_v3  ;;  %v1484_v19 = vmul.f32 %v236_v18, %v211_v6  ;;  %2259 = vst [vmem:[#allocation11_spill] sm:$0xff] %v1506_v24  ;;  %v1547_v37 = vand.u32 127, %v245_v34 }
 0x10d   :  { %581 = vrot.lane.b32.xlu1 %v237_v41, %s1293_s7  ;;  %386 = vrot.lane.b32.xlu0 %v239_v42, %s1292_s6 }
 0x10e   :  { %v1563_v47 = vadd.s32 128, %v1547_v37  ;;  %v1574_v53 = vadd.s32 384, %v1547_v37  ;;  %vm2244_vm1 = vcmp.lt.s32.totalorder %v1547_v37, 17  ;;  %v254_v59 = vand.u32 255, %v1547_v37 }
 0x10f   :  { %v1508_v25 = vpop.permute.xlu0 %875  ;;  %v1518_v26 = vpop.permute.xlu1 %915  ;;  %v2235_v60 = vand.u32 15, %v1547_v37  ;;  %vm2245_vm10 = vcmp.lt.s32.totalorder %v1547_v37, 1  ;;  %vm2242_vm11 = vcmp.lt.s32.totalorder %v1547_v37, 16  ;;  %vm2247_vm12 = vcmp.lt.s32.totalorder %v1547_v37, 113 }
 0x110   :  { %2260 = vst [vmem:[#allocation12_spill] sm:$0xff] %v1518_v26  ;;  %v2236_v54 = vand.u32 15, %v1563_v47  ;;  %v2237_v5 = vand.u32 15, %v1574_v53  ;;  %vm1609_vm6 = vcmp.ge.s32.totalorder %v254_v59, 16  ;;  %vm2248_vm13 = vcmp.lt.s32.totalorder %v1547_v37, 15 }
 0x111   :  { %589 = vrot.lane.b32.xlu1 %v239_v42, %s1293_s7  ;;  %455 = vrot.lane.b32.xlu0 %v239_v42, %s1291_s1  ;;  %vm1615_vm7 = vcmp.ge.s32.totalorder %v2235_v60, 1 }
 0x112   :  { %vm1595_vm4 = vcmp.ge.s32.totalorder %v2236_v54, 1  ;;  %vm1630_vm8 = vcmp.ge.s32.totalorder %v2237_v5, 1  ;;  %vm2240_vm9 = vmand %vm1609_vm6, %vm1615_vm7  ;;  %v1300_v5 = vmov 35  }
 0x113   :  { %v1520_v27 = vpop.permute.xlu0 %919  ;;  %1197 = vset.pattern.permute.xlu1 %v1300_v5  ;;  %1198 = vset.pattern.permute.xlu0 %v1300_v5 }
 0x114   :  { %2261 = vst [vmem:[#allocation13_spill] sm:$0xff] %v1520_v27 }
 0x115   :  { %646 = vrot.lane.b32.xlu1 %v237_v41, %s1294_s8  ;;  %512 = vrot.lane.b32.xlu0 %v237_v41, %s1295_s9 }
 0x119   :  { %711 = vrot.lane.b32.xlu1 %v237_v41, %s1296_s10  ;;  %520 = vrot.lane.b32.xlu0 %v239_v42, %s1295_s9 }
 0x11d   :  { %719 = vrot.lane.b32.xlu1 %v239_v42, %s1296_s10  ;;  %654 = vrot.lane.b32.xlu0 %v239_v42, %s1294_s8 }
 0x121   :  { %780 = vrot.lane.b32.xlu1 %v237_v41, %s1297_s11  ;;  %853 = vrot.lane.b32.xlu0 %v239_v42, %s1298_s12 }
 0x125   :  { %788 = vrot.lane.b32.xlu1 %v239_v42, %s1297_s11  ;;  %382 = vrot.lane.b32.xlu0 %v238_v43, %s1292_s6 }
 0x129   :  { %845 = vrot.lane.b32.xlu1 %v237_v41, %s1298_s12  ;;  %390 = vrot.lane.b32.xlu0 %v1396_v51, %s1292_s6  ;;  %v1556_v41 = vadd.s32 256, %v1547_v37 }
 0x12b   :  { %v268_v48 = vand.u32 255, %v1556_v41  ;;  %v2238_v49 = vand.u32 15, %v1556_v41 }
 0x12d   :  { %585 = vrot.lane.b32.xlu1 %v238_v43, %s1293_s7  ;;  %451 = vrot.lane.b32.xlu0 %v238_v43, %s1291_s1  ;;  %vm1578_vm2 = vcmp.ge.s32.totalorder %v268_v48, 16  ;;  %vm1584_vm3 = vcmp.ge.s32.totalorder %v2238_v49, 1 }
 0x12e   :  { %vm2241_vm5 = vmand %vm1578_vm2, %vm1584_vm3 }
 0x131   :  { %593 = vrot.lane.b32.xlu1 %v1396_v51, %s1293_s7  ;;  %459 = vrot.lane.b32.xlu0 %v1396_v51, %s1291_s1 }
 0x135   :  { %715 = vrot.lane.b32.xlu1 %v238_v43, %s1296_s10  ;;  %516 = vrot.lane.b32.xlu0 %v238_v43, %s1295_s9 }
 0x139   :  { %723 = vrot.lane.b32.xlu1 %v1396_v51, %s1296_s10  ;;  %524 = vrot.lane.b32.xlu0 %v1396_v51, %s1295_s9 }
 0x13d   :  { %784 = vrot.lane.b32.xlu1 %v238_v43, %s1297_s11  ;;  %650 = vrot.lane.b32.xlu0 %v238_v43, %s1294_s8 }
 0x141   :  { %792 = vrot.lane.b32.xlu1 %v1396_v51, %s1297_s11  ;;  %658 = vrot.lane.b32.xlu0 %v1396_v51, %s1294_s8 }
 0x145   :  { %380 = vrot.lane.b32.xlu1 %v1425_v61, %s1292_s6  ;;  %849 = vrot.lane.b32.xlu0 %v238_v43, %s1298_s12 }
 0x149   :  { %388 = vrot.lane.b32.xlu1 %v1432_v0, %s1292_s6  ;;  %583 = vrot.lane.b32.xlu0 %v1425_v61, %s1293_s7 }
 0x14d   :  { %449 = vrot.lane.b32.xlu1 %v1425_v61, %s1291_s1  ;;  %591 = vrot.lane.b32.xlu0 %v1432_v0, %s1293_s7 }
 0x151   :  { %457 = vrot.lane.b32.xlu1 %v1432_v0, %s1291_s1  ;;  %713 = vrot.lane.b32.xlu0 %v1425_v61, %s1296_s10 }
 0x155   :  { %514 = vrot.lane.b32.xlu1 %v1425_v61, %s1295_s9  ;;  %721 = vrot.lane.b32.xlu0 %v1432_v0, %s1296_s10 }
 0x159   :  { %522 = vrot.lane.b32.xlu1 %v1432_v0, %s1295_s9  ;;  %782 = vrot.lane.b32.xlu0 %v1425_v61, %s1297_s11 }
 0x15d   :  { %648 = vrot.lane.b32.xlu1 %v1425_v61, %s1294_s8  ;;  %790 = vrot.lane.b32.xlu0 %v1432_v0, %s1297_s11 }
 0x161   :  { %656 = vrot.lane.b32.xlu1 %v1432_v0, %s1294_s8  ;;  %587 = vrot.lane.b32.xlu0 %v1478_v17, %s1293_s7 }
 0x165   :  { %847 = vrot.lane.b32.xlu1 %v1425_v61, %s1298_s12  ;;  %595 = vrot.lane.b32.xlu0 %v1484_v19, %s1293_s7 }
 0x169   :  { %855 = vrot.lane.b32.xlu1 %v1432_v0, %s1298_s12  ;;  %717 = vrot.lane.b32.xlu0 %v1478_v17, %s1296_s10 }
 0x16d   :  { %384 = vrot.lane.b32.xlu1 %v1478_v17, %s1292_s6  ;;  %725 = vrot.lane.b32.xlu0 %v1484_v19, %s1296_s10 }
 0x171   :  { %392 = vrot.lane.b32.xlu1 %v1484_v19, %s1292_s6  ;;  %786 = vrot.lane.b32.xlu0 %v1478_v17, %s1297_s11 }
 0x175   :  { %453 = vrot.lane.b32.xlu1 %v1478_v17, %s1291_s1  ;;  %794 = vrot.lane.b32.xlu0 %v1484_v19, %s1297_s11 }
 0x179   :  { %461 = vrot.lane.b32.xlu1 %v1484_v19, %s1291_s1  ;;  %857 = vrot.lane.b32.xlu0 %v1396_v51, %s1298_s12 }
 0x17b   :  { %v1526_v28 = vpop.permute.xlu1 %447  ;;  %v379_v29 = vpop.permute.xlu0 %378 }
 0x17d   :  { %518 = vrot.lane.b32.xlu1 %v1478_v17, %s1295_s9  ;;  %966 = vrot.lane.b32.xlu0 %v1348_v7, %s1299_s13 }
 0x17f   :  { %v1531_v30 = vpop.permute.xlu1 %581  ;;  %v387_v31 = vpop.permute.xlu0 %386 }
 0x181   :  { %526 = vrot.lane.b32.xlu1 %v1484_v19, %s1295_s9 }
 0x183   :  { %v1535_v32 = vpop.permute.xlu1 %589  ;;  %v1537_v33 = vpop.permute.xlu0 %455 }
 0x185   :  { %652 = vrot.lane.b32.xlu1 %v1478_v17, %s1294_s8 }
 0x187   :  { %v1541_v35 = vpop.permute.xlu1 %646  ;;  %v1543_v36 = vpop.permute.xlu0 %512 }
 0x189   :  { %660 = vrot.lane.b32.xlu1 %v1484_v19, %s1294_s8 }
 0x18b   :  { %v1549_v38 = vpop.permute.xlu1 %711  ;;  %v1551_v39 = vpop.permute.xlu0 %520 }
 0x18d   :  { %851 = vrot.lane.b32.xlu1 %v1478_v17, %s1298_s12 }
 0x18f   :  { %v1558_v42 = vpop.permute.xlu1 %719  ;;  %v1560_v43 = vpop.permute.xlu0 %654 }
 0x191   :  { %859 = vrot.lane.b32.xlu1 %v1484_v19, %s1298_s12 }
 0x193   :  { %v1569_v50 = vpop.permute.xlu1 %780  ;;  %v1571_v52 = vpop.permute.xlu0 %853 }
 0x195   :  { %963 = vperm.xlu1 %1197, %v1348_v7  }
 0x197   :  { %v1590_v62 = vpop.permute.xlu1 %788  ;;  %v383_v3 = vpop.permute.xlu0 %382 }
 0x198   :  { %v397_v9 = vsel %vm2244_vm1, %v383_v3, %v387_v31  ;;  %v399_v10 = vsel %vm2244_vm1, %v379_v29, %v383_v3 }
 0x199   :  { %v416_v13 = vmul.f32 %v1411_v55, %v399_v10  ;;  %v417_v14 = vmul.f32 %v1411_v55, %v397_v9 }
 0x19b   :  { %v432_v48 = vsel %vm1595_vm4, %v416_v13, 0.0  ;;  %v433_v3 = vsel %vm2241_vm5, %v417_v14, 0.0  ;;  %v1626_v9 = vpop.permute.xlu1 %845  ;;  %v391_v10 = vpop.permute.xlu0 %390 }
 0x19c   :  { %v440_v60 = vadd.f32 %v432_v48, %v1380_v46  ;;  %v441_v54 = vadd.f32 %v433_v3, %v1375_v45  ;;  %v395_v13 = vsel %vm2244_vm1, %v387_v31, %v391_v10  ;;  %v401_v14 = vsel %vm2244_vm1, %v391_v10, %v379_v29 }
 0x19d   :  { %v415_v49 = vmul.f32 %v1411_v55, %v401_v14  ;;  %v418_v27 = vmul.f32 %v1411_v55, %v395_v13  ;;  %v373_v45 = vmul.f32 %v1369_v40, %v1396_v51  ;;  %v261_v13 = vand.u32 255, %v1563_v47 }
 0x19e   :  { %vm2249_vm1 = vcmp.lt.s32.totalorder %v1547_v37, 127 }
 0x19f   :  { %v431_v46 = vsel %vm2240_vm9, %v415_v49, 0.0  ;;  %v434_v29 = vsel %vm1630_vm8, %v418_v27, 0.0  ;;  %v586_v55 = vpop.permute.xlu1 %585  ;;  %v452_v31 = vpop.permute.xlu0 %451  ;;  %vm1698_vm15 = vcmp.lt.s32.totalorder %v261_v13, 240 }
 0x1a0   :  { %v439_v48 = vadd.f32 %v431_v46, %v1372_v44  ;;  %v442_v7 = vadd.f32 %v434_v29, %v373_v45  ;;  %v600_v40 = vsel %vm2245_vm10, %v586_v55, %v1535_v32  ;;  %v602_v51 = vsel %vm2245_vm10, %v1531_v30, %v586_v55 }
 0x1a1   :  { %v466_v49 = vsel %vm2242_vm11, %v452_v31, %v1537_v33  ;;  %v468_v27 = vsel %vm2242_vm11, %v1526_v28, %v452_v31 }
 0x1a2   :  { %v481_v5 = vmul.f32 %v1434_v1, %v468_v27  ;;  %v482_v44 = vmul.f32 %v1434_v1, %v466_v49 }
 0x1a3   :  { %v594_v3 = vpop.permute.xlu1 %593  ;;  %v460_v10 = vpop.permute.xlu0 %459 }
 0x1a4   :  { %v498_v14 = vsel %vm1578_vm2, %v482_v44, 0.0  ;;  %v505_v45 = vadd.f32 %v481_v5, %v440_v60  ;;  %v598_v46 = vsel %vm2245_vm10, %v1535_v32, %v594_v3  ;;  %v604_v29 = vsel %vm2245_vm10, %v594_v3, %v1531_v30 }
 0x1a5   :  { %v506_v55 = vadd.f32 %v498_v14, %v441_v54  ;;  %v464_v31 = vsel %vm2242_vm11, %v1537_v33, %v460_v10  ;;  %v470_v60 = vsel %vm2242_vm11, %v460_v10, %v1526_v28  ;;  %v2274_v32 = vand.u32 15, %v1556_v41 }
 0x1a6   :  { %v483_v49 = vmul.f32 %v1434_v1, %v464_v31  ;;  %v480_v30 = vmul.f32 %v1434_v1, %v470_v60  ;;  %v2279_v5 = vand.u32 15, %v1563_v47  ;;  %v615_v47 = vmul.f32 %v1464_v12, %v602_v51 }
 0x1a7   :  { %vm1693_vm14 = vcmp.le.s32.totalorder %v2274_v32, 14  ;;  %v716_v54 = vpop.permute.xlu1 %715  ;;  %v517_v28 = vpop.permute.xlu0 %516  ;;  %v275_v14 = vand.u32 255, %v1574_v53  ;;  %v616_v31 = vmul.f32 %v1464_v12, %v600_v40  ;;  %v614_v32 = vmul.f32 %v1464_v12, %v604_v29 }
 0x1a8   :  { %vm1704_vm0 = vcmp.le.s32.totalorder %v2279_v5, 14  ;;  %v507_v3 = vadd.f32 %v483_v49, %v442_v7  ;;  %v730_v41 = vsel %vm2247_vm12, %v716_v54, %v1558_v42  ;;  %v732_v1 = vsel %vm2247_vm12, %v1549_v38, %v716_v54  ;;  %vm2246_vm9 = vmand %vm1578_vm2, %vm1693_vm14 }
 0x1a9   :  { %v531_v10 = vsel %vm2248_vm13, %v517_v28, %v1551_v39  ;;  %v496_v13 = vsel %vm1609_vm6, %v480_v30, 0.0  ;;  %v533_v7 = vsel %vm2248_vm13, %v1543_v36, %v517_v28  ;;  %v2282_v54 = vand.u32 15, %v1547_v37 }
 0x1aa   :  { %v504_v60 = vadd.f32 %v496_v13, %v439_v48  ;;  %v550_v49 = vmul.f32 %v1444_v2, %v533_v7  ;;  %v551_v51 = vmul.f32 %v1444_v2, %v531_v10  ;;  %v2285_v28 = vand.u32 15, %v1574_v53 }
 0x1ab   :  { %v724_v30 = vpop.permute.xlu1 %723  ;;  %vm1734_vm5 = vcmp.le.s32.totalorder %v2282_v54, 14  ;;  %v525_v48 = vpop.permute.xlu0 %524  ;;  %v617_v13 = vmul.f32 %v1464_v12, %v598_v46  ;;  %vm1759_vm10 = vcmp.lt.s32.totalorder %v275_v14, 240  ;;  %v748_v46 = vmul.f32 %v1488_v21, %v732_v1 }
 0x1ac   :  { %vm1740_vm11 = vcmp.le.s32.totalorder %v2285_v28, 14  ;;  %v566_v40 = vsel %vm1704_vm0, %v550_v49, 0.0  ;;  %v567_v29 = vsel %vm2246_vm9, %v551_v51, 0.0  ;;  %v728_v53 = vsel %vm2247_vm12, %v1558_v42, %v724_v30 }
 0x1ad   :  { %v734_v10 = vsel %vm2247_vm12, %v724_v30, %v1549_v38  ;;  %v574_v7 = vadd.f32 %v566_v40, %v505_v45  ;;  %v575_v54 = vadd.f32 %v567_v29, %v506_v55  ;;  %v631_v51 = vsel %vm1595_vm4, %v615_v47, 0.0 }
 0x1ae   :  { %v632_v42 = vsel %vm1584_vm3, %v616_v31, 0.0  ;;  %v529_v12 = vsel %vm2248_vm13, %v1551_v39, %v525_v48  ;;  %v535_v38 = vsel %vm2248_vm13, %v525_v48, %v1543_v36  ;;  %v630_v45 = vsel %vm1615_vm7, %v614_v32, 0.0  ;;  %vm2292_vm13 = vmand %vm1609_vm6, %vm1734_vm5 }
 0x1af   :  { %v549_v55 = vmul.f32 %v1444_v2, %v535_v38  ;;  %v552_v47 = vmul.f32 %v1444_v2, %v529_v12  ;;  %v785_v14 = vpop.permute.xlu1 %784  ;;  %v651_v31 = vpop.permute.xlu0 %650  ;;  %vm2290_vm12 = vcmp.lt.s32.totalorder %v1547_v37, 112  ;;  %v639_v36 = vadd.f32 %v631_v51, %v574_v7 }
 0x1b0   :  { %v799_v30 = vsel %vm2290_vm12, %v785_v14, %v1590_v62  ;;  %vm2291_vm9 = vmmov %vm2290_vm12  ;;  %v665_v32 = vsel %vm2249_vm1, %v651_v31, %v1560_v43  ;;  %v633_v1 = vsel %vm1630_vm8, %v617_v13, 0.0  ;;  %v749_v2 = vmul.f32 %v1488_v21, %v730_v41 }
 0x1b1   :  { %v801_v39 = vsel %vm2291_vm9, %v1569_v50, %v785_v14  ;;  %v565_v28 = vsel %vm2292_vm13, %v549_v55, 0.0  ;;  %v568_v48 = vsel %vm1740_vm11, %v552_v47, 0.0  ;;  %vm2253_vm9 = vmand %vm1698_vm15, %vm1595_vm4  ;;  %v667_v41 = vsel %vm2249_vm1, %v1541_v35, %v651_v31 }
 0x1b2   :  { %v573_v40 = vadd.f32 %v565_v28, %v504_v60  ;;  %v576_v29 = vadd.f32 %v568_v48, %v507_v3  ;;  %v680_v13 = vmul.f32 %v1474_v15, %v665_v32  ;;  %v764_v7 = vsel %vm1615_vm7, %v748_v46, 0.0  ;;  %vm2293_vm13 = vmmov %vm2290_vm12 }
 0x1b3   :  { %v814_v51 = vmul.f32 %v1498_v22, %v799_v30  ;;  %v679_v12 = vmul.f32 %v1474_v15, %v667_v41  ;;  %v793_v38 = vpop.permute.xlu1 %792  ;;  %v640_v55 = vadd.f32 %v632_v42, %v575_v54  ;;  %v659_v47 = vpop.permute.xlu0 %658  ;;  %v765_v46 = vsel %vm2253_vm9, %v749_v2, 0.0 }
 0x1b4   :  { %v638_v14 = vadd.f32 %v630_v45, %v573_v40  ;;  %v696_v3 = vsel %vm1704_vm0, %v680_v13, 0.0  ;;  %v797_v60 = vsel %vm2290_vm12, %v1590_v62, %v793_v38  ;;  %v803_v31 = vsel %vm2293_vm13, %v793_v38, %v1569_v50  ;;  %vm2250_vm12 = vmand %vm1759_vm10, %vm1630_vm8 }
 0x1b5   :  { %v750_v54 = vmul.f32 %v1488_v21, %v728_v53  ;;  %v695_v42 = vsel %vm1734_vm5, %v679_v12, 0.0  ;;  %v704_v45 = vadd.f32 %v696_v3, %v639_v36  ;;  %v641_v32 = vadd.f32 %v633_v1, %v576_v29 }
 0x1b6   :  { %v703_v30 = vadd.f32 %v695_v42, %v638_v14  ;;  %v663_v62 = vsel %vm2249_vm1, %v1560_v43, %v659_v47  ;;  %v669_v50 = vsel %vm2249_vm1, %v659_v47, %v1541_v35  ;;  %v751_v28 = vmul.f32 %v1488_v21, %v734_v10  ;;  %vm2251_vm1 = vmand %vm1698_vm15, %vm1704_vm0 }
 0x1b7   :  { %v773_v48 = vadd.f32 %v765_v46, %v704_v45  ;;  %v681_v2 = vmul.f32 %v1474_v15, %v663_v62  ;;  %v682_v53 = vmul.f32 %v1474_v15, %v669_v50  ;;  %v1839_v40 = vpop.permute.xlu1 %380  ;;  %v850_v36 = vpop.permute.xlu0 %849  ;;  %v813_v43 = vmul.f32 %v1498_v22, %v801_v39 }
 0x1b8   :  { %v830_v35 = vsel %vm1698_vm15, %v814_v51, 0.0  ;;  %v772_v1 = vadd.f32 %v764_v7, %v703_v30  ;;  %v816_v21 = vmul.f32 %v1498_v22, %v803_v31  ;;  %v766_v38 = vsel %vm1584_vm3, %v750_v54, 0.0 }
 0x1b9   :  { %v697_v10 = vsel %vm1693_vm14, %v681_v2, 0.0  ;;  %v698_v15 = vsel %vm1740_vm11, %v682_v53, 0.0  ;;  %v838_v29 = vadd.f32 %v830_v35, %v773_v48  ;;  %v767_v39 = vsel %vm2250_vm12, %v751_v28, 0.0 }
 0x1ba   :  { %v705_v41 = vadd.f32 %v697_v10, %v640_v55  ;;  %v706_v13 = vadd.f32 %v698_v15, %v641_v32  ;;  %v837_v12 = vadd.f32 %v813_v43, %v772_v1  ;;  %v815_v47 = vmul.f32 %v1498_v22, %v797_v60 }
 0x1bb   :  { %v1860_v7 = vpop.permute.xlu1 %388  ;;  %v584_v51 = vpop.permute.xlu0 %583  ;;  %v832_v55 = vsel %vm1759_vm10, %v816_v21, 0.0  ;;  %vm2252_vm13 = vcmp.lt.s32.totalorder %v1547_v37, 111  ;;  %vm2297_vm12 = vcmp.lt.s32.totalorder %v1547_v37, 1  ;;  %vm2301_vm9 = vcmp.lt.s32.totalorder %v1547_v37, 17 }
 0x1bc   :  { %v774_v14 = vadd.f32 %v766_v38, %v705_v41  ;;  %v775_v3 = vadd.f32 %v767_v39, %v706_v13  ;;  %v864_v48 = vsel %vm2252_vm13, %v850_v36, %v1571_v52  ;;  %v866_v2 = vsel %vm2252_vm13, %v1626_v9, %v850_v36 }
 0x1bd   :  { %v882_v35 = vmul.f32 %v1508_v25, %v866_v2  ;;  %v883_v1 = vmul.f32 %v1508_v25, %v864_v48  ;;  %v374_v2 = vmul.f32 %v1427_v63, %v1425_v61  ;;  %v375_v61 = vmul.f32 %v1427_v63, %v1478_v17 }
 0x1be   :  { %v1865_v31 = vadd.f32 %v815_v47, %v774_v14  ;;  %v1867_v46 = vadd.f32 %v832_v55, %v775_v3 }
 0x1bf   :  { %v1869_v54 = vpop.permute.xlu1 %449  ;;  %v592_v42 = vpop.permute.xlu0 %591  ;;  %v898_v15 = vsel %vm1734_vm5, %v882_v35, 0.0  ;;  %v899_v36 = vsel %vm2251_vm1, %v883_v1, 0.0  ;;  %vm2298_vm1 = vmmov %vm2297_vm12 }
 0x1c0   :  { %v906_v38 = vadd.f32 %v898_v15, %v837_v12  ;;  %v907_v39 = vadd.f32 %v899_v36, %v838_v29  ;;  %vm2299_vm13 = vmmov %vm2298_vm1 }
 0x1c2   :  { %v1912_v3 = vadd.f32 %v1518_v26, %v906_v38  ;;  %v1915_v55 = vadd.f32 %v1518_v26, %v907_v39  ;;  %v376_v38 = vmul.f32 %v1427_v63, %v1432_v0 }
 0x1c3   :  { %v1871_v45 = vpop.permute.xlu1 %457  ;;  %v1873_v30 = vpop.permute.xlu0 %713 }
 0x1c4   :  { %2295 = vst [vmem:[#allocation15_spill] sm:$0xff] %v1912_v3  ;;  %2296 = vst [vmem:[#allocation16_spill] sm:$0xff] %v1915_v55  ;;  %v1924_v12 = vadd.f32 3.0, %v1912_v3  ;;  %v1931_v36 = vadd.f32 3.0, %v1915_v55 }
 0x1c7   :  { %v1875_v32 = vpop.permute.xlu1 %514  ;;  %v722_v62 = vpop.permute.xlu0 %721 }
 0x1cb   :  { %v1877_v22 = vpop.permute.xlu1 %522  ;;  %v1879_v60 = vpop.permute.xlu0 %782 }
 0x1cf   :  { %v1881_v50 = vpop.permute.xlu1 %648  ;;  %v1883_v28 = vpop.permute.xlu0 %790 }
 0x1d3   :  { %v1892_v53 = vpop.permute.xlu1 %656  ;;  %v588_v43 = vpop.permute.xlu0 %587 }
 0x1d4   :  { %v603_v35 = vsel %vm2297_vm12, %v584_v51, %v588_v43  ;;  %v601_v29 = vsel %vm2298_vm1, %v588_v43, %v592_v42  ;;  %vm2300_vm12 = vmmov %vm2298_vm1  ;;  %v1944_v43 = vmul.f32 %v1427_v63, %v1484_v19  ;;  %vm2302_vm1 = vcmp.lt.s32.totalorder %v1547_v37, 113 }
 0x1d7   :  { %v1900_v21 = vpop.permute.xlu1 %847  ;;  %v596_v10 = vpop.permute.xlu0 %595 }
 0x1d8   :  { %2294 = vst [vmem:[#allocation14_spill] sm:$0xff] %v1900_v21  ;;  %v605_v15 = vsel %vm2299_vm13, %v596_v10, %v584_v51  ;;  %v599_v39 = vsel %vm2300_vm12, %v592_v42, %v596_v10  ;;  %v1947_v51 = vmul.f32 %v1462_v11, %v603_v35  ;;  %vm2303_vm13 = vmmov %vm2301_vm9  ;;  %v1956_v10 = vmul.f32 %v1462_v11, %v601_v29 }
 0x1d9   :  { %v1959_v55 = vmul.f32 %v1462_v11, %v605_v15  ;;  %vm2305_vm12 = vmmov %vm2303_vm13  ;;  %v1968_v26 = vmul.f32 %v1462_v11, %v599_v39 }
 0x1db   :  { %v1909_v41 = vpop.permute.xlu1 %855  ;;  %v718_v13 = vpop.permute.xlu0 %717 }
 0x1dc   :  { %v733_v17 = vsel %vm2302_vm1, %v1873_v30, %v718_v13 }
 0x1dd   :  { %v1973_v21 = vmul.f32 %v1486_v20, %v733_v17 }
 0x1df   :  { %v385_v47 = vpop.permute.xlu1 %384  ;;  %v726_v14 = vpop.permute.xlu0 %725 }
 0x1e0   :  { %v400_v3 = vsel %vm2301_vm9, %v1839_v40, %v385_v47  ;;  %v398_v0 = vsel %vm2303_vm13, %v385_v47, %v1860_v7  ;;  %vm2304_vm9 = vmmov %vm2302_vm1 }
 0x1e1   :  { %v731_v63 = vsel %vm2304_vm9, %v718_v13, %v722_v62  ;;  %v420_v47 = vmul.f32 %v1417_v58, %v400_v3  ;;  %v421_v15 = vmul.f32 %v1417_v58, %v398_v0  ;;  %v729_v13 = vsel %vm2302_vm1, %v722_v62, %v726_v14  ;;  %vm2306_vm13 = vmmov %vm2305_vm12 }
 0x1e2   :  { %v753_v11 = vmul.f32 %v1486_v20, %v731_v63  ;;  %vm2307_vm9 = vcmp.lt.s32.totalorder %v1547_v37, 16  ;;  %v735_v63 = vsel %vm2302_vm1, %v726_v14, %v1873_v30  ;;  %vm2312_vm1 = vmand %vm1609_vm6, %vm1615_vm7 }
 0x1e3   :  { %v393_v48 = vpop.permute.xlu1 %392  ;;  %v1921_v1 = vpop.permute.xlu0 %786 }
 0x1e4   :  { %v402_v19 = vsel %vm2305_vm12, %v393_v48, %v1839_v40  ;;  %v396_v40 = vsel %vm2306_vm13, %v1860_v7, %v393_v48  ;;  %vm2308_vm12 = vmmov %vm2307_vm9  ;;  %v634_v48 = vsel %vm1615_vm7, %v1959_v55, 0.0 }
 0x1e5   :  { %v419_v3 = vmul.f32 %v1417_v58, %v402_v19  ;;  %v2006_v19 = vmul.f32 %v1486_v20, %v729_v13  ;;  %v422_v29 = vmul.f32 %v1417_v58, %v396_v40  ;;  %vm2309_vm13 = vmmov %vm2307_vm9 }
 0x1e7   :  { %v454_v42 = vpop.permute.xlu1 %453  ;;  %v1981_v35 = vpop.permute.xlu0 %794 }
 0x1e8   :  { %v467_v39 = vsel %vm2307_vm9, %v454_v42, %v1871_v45  ;;  %v469_v17 = vsel %vm2308_vm12, %v1869_v54, %v454_v42  ;;  %v436_v42 = vsel %vm1595_vm4, %v420_v47, 0.0  ;;  %vm2310_vm9 = vmand %vm1578_vm2, %vm1584_vm3 }
 0x1e9   :  { %v437_v30 = vsel %vm2310_vm9, %v421_v15, 0.0  ;;  %v485_v14 = vmul.f32 %v1452_v4, %v469_v17  ;;  %v486_v47 = vmul.f32 %v1452_v4, %v467_v39  ;;  %vm2311_vm12 = vmand %vm1698_vm15, %vm1595_vm4  ;;  %v435_v15 = vsel %vm2312_vm1, %v419_v3, 0.0 }
 0x1ea   :  { %v444_v39 = vadd.f32 %v436_v42, %v375_v61  ;;  %v755_v17 = vmul.f32 %v1486_v20, %v735_v63  ;;  %vm2313_vm9 = vcmp.lt.s32.totalorder %v1547_v37, 15  ;;  %v445_v62 = vadd.f32 %v437_v30, %v376_v38 }
 0x1eb   :  { %v462_v0 = vpop.permute.xlu1 %461  ;;  %v858_v55 = vpop.permute.xlu0 %857  ;;  %v443_v61 = vadd.f32 %v435_v15, %v374_v2  ;;  %vm2315_vm1 = vcmp.lt.s32.totalorder %v1547_v37, 111 }
 0x1ec   :  { %v471_v7 = vsel %vm2309_vm13, %v462_v0, %v1869_v54  ;;  %v2030_v54 = vsel %vm2311_vm12, %v753_v11, 0.0  ;;  %v465_v58 = vsel %vm2309_vm13, %v1871_v45, %v462_v0  ;;  %vm2314_vm12 = vmmov %vm2313_vm9  ;;  %v502_v45 = vsel %vm1578_vm2, %v486_v47, 0.0 }
 0x1ed   :  { %v484_v13 = vmul.f32 %v1452_v4, %v471_v7  ;;  %v438_v7 = vsel %vm1630_vm8, %v422_v29, 0.0  ;;  %v509_v0 = vadd.f32 %v485_v14, %v444_v39  ;;  %v487_v38 = vmul.f32 %v1452_v4, %v465_v58  ;;  %vm2316_vm13 = vmmov %vm2315_vm1 }
 0x1ee   :  { %v862_v29 = vsel %vm2315_vm1, %v1571_v52, %v858_v55  ;;  %v868_v2 = vsel %vm2316_vm13, %v858_v55, %v1626_v9  ;;  %vm2318_vm1 = vmand %vm1759_vm10, %vm1630_vm8  ;;  %v446_v58 = vadd.f32 %v438_v7, %v1944_v43  ;;  %v510_v9 = vadd.f32 %v502_v45, %v445_v62 }
 0x1ef   :  { %v519_v40 = vpop.permute.xlu1 %518  ;;  %v500_v42 = vsel %vm1609_vm6, %v484_v13, 0.0  ;;  %v771_v52 = vsel %vm2318_vm1, %v755_v17, 0.0  ;;  %v884_v13 = vmul.f32 %v1508_v25, %v862_v29  ;;  %vm2319_vm13 = vmand %vm1578_vm2, %vm1693_vm14  ;;  %vm2321_vm2 = vcmp.lt.s32.totalorder %v1547_v37, 127 }
 0x1f0   :  { %v532_v11 = vsel %vm2313_vm9, %v519_v40, %v1877_v22  ;;  %v534_v20 = vsel %vm2314_vm12, %v1875_v32, %v519_v40  ;;  %vm2317_vm12 = vmmov %vm2313_vm9  ;;  %v508_v15 = vadd.f32 %v500_v42, %v443_v61  ;;  %v511_v39 = vadd.f32 %v487_v38, %v446_v58 }
 0x1f1   :  { %v554_v63 = vmul.f32 %v1456_v8, %v534_v20  ;;  %v555_v30 = vmul.f32 %v1456_v8, %v532_v11  ;;  %vm2322_vm1 = vmmov %vm2321_vm2  ;;  %v900_v42 = vsel %vm1693_vm14, %v884_v13, 0.0  ;;  %v2330_v13 = vsel %vm1630_vm8, %v1968_v26, 0.0 }
 0x1f2   :  { %vm2333_vm8 = vcmp.lt.s32.totalorder %v1547_v37, 111 }
 0x1f3   :  { %v527_v3 = vpop.permute.xlu1 %526  ;;  %v570_v14 = vsel %vm1704_vm0, %v554_v63, 0.0  ;;  %v571_v17 = vsel %vm2319_vm13, %v555_v30, 0.0  ;;  %v2325_v63 = vsel %vm1595_vm4, %v1947_v51, 0.0  ;;  %vm2326_vm4 = vmmov %vm2322_vm1 }
 0x1f4   :  { %v530_v4 = vsel %vm2313_vm9, %v1877_v22, %v527_v3  ;;  %v536_v47 = vsel %vm2317_vm12, %v527_v3, %v1875_v32  ;;  %v578_v40 = vadd.f32 %v570_v14, %v509_v0  ;;  %v885_v32 = vmul.f32 %v1508_v25, %v868_v2  ;;  %vm2320_vm9 = vmand %vm1609_vm6, %vm1734_vm5 }
 0x1f5   :  { %v553_v55 = vmul.f32 %v1456_v8, %v536_v47  ;;  %v556_v22 = vmul.f32 %v1456_v8, %v530_v4  ;;  %vm873_vm12 = vmand %vm1759_vm10, %vm1740_vm11  ;;  %vm2323_vm6 = vcmp.lt.s32.totalorder %v1547_v37, 112  ;;  %v579_v61 = vadd.f32 %v571_v17, %v510_v9  ;;  %v2334_v17 = vld [vmem:[#allocation14_spill] sm:$0xff] }
 0x1f6   :  { %v800_v11 = vsel %vm2323_vm6, %v1921_v1, %v1883_v28  ;;  %vm2324_vm13 = vmmov %vm2323_vm6  ;;  %v643_v38 = vadd.f32 %v2325_v63, %v578_v40 }
 0x1f7   :  { %v569_v43 = vsel %vm2320_vm9, %v553_v55, 0.0  ;;  %v653_v62 = vpop.permute.xlu1 %652  ;;  %v572_v8 = vsel %vm1740_vm11, %v556_v22, 0.0  ;;  %v802_v3 = vsel %vm2324_vm13, %v1879_v60, %v1921_v1  ;;  %v901_v1 = vsel %vm873_vm12, %v885_v32, 0.0  ;;  %vm2327_vm9 = vmmov %vm2322_vm1 }
 0x1f8   :  { %v577_v25 = vadd.f32 %v569_v43, %v508_v15  ;;  %v666_v56 = vsel %vm2321_vm2, %v653_v62, %v1892_v53  ;;  %v668_v18 = vsel %vm2322_vm1, %v1881_v50, %v653_v62  ;;  %v580_v45 = vadd.f32 %v572_v8, %v511_v39  ;;  %vm2328_vm2 = vmmov %vm2323_vm6  ;;  %v2336_v62 = vld [vmem:[#allocation12_spill] sm:$0xff] }
 0x1f9   :  { %v683_v7 = vmul.f32 %v1476_v16, %v668_v18  ;;  %v684_v20 = vmul.f32 %v1476_v16, %v666_v56  ;;  %v818_v4 = vmul.f32 %v1500_v23, %v800_v11  ;;  %v804_v47 = vsel %vm2328_vm2, %v1981_v35, %v1879_v60  ;;  %vm2335_vm1 = vmmov %vm2333_vm8  ;;  %v2337_v56 = vld [vmem:[#allocation11_spill] sm:$0xff] }
 0x1fa   :  { %v642_v0 = vadd.f32 %v634_v48, %v577_v25  ;;  %v908_v55 = vadd.f32 %v900_v42, %v1865_v31  ;;  %v909_v15 = vadd.f32 %v901_v1, %v1867_v46  ;;  %v645_v40 = vadd.f32 %v2330_v13, %v580_v45  ;;  %vm2339_vm6 = vmand %vm1698_vm15, %vm1704_vm0 }
 0x1fb   :  { %v699_v29 = vsel %vm1734_vm5, %v683_v7, 0.0  ;;  %v700_v48 = vsel %vm1704_vm0, %v684_v20, 0.0  ;;  %v661_v30 = vpop.permute.xlu1 %660  ;;  %v2331_v60 = vsel %vm1615_vm7, %v1973_v21, 0.0  ;;  %v817_v39 = vmul.f32 %v1500_v23, %v802_v3  ;;  %vm2332_vm7 = vmmov %vm2328_vm2 }
 0x1fc   :  { %v707_v6 = vadd.f32 %v699_v29, %v642_v0  ;;  %v708_v2 = vadd.f32 %v700_v48, %v643_v38  ;;  %v664_v51 = vsel %vm2326_vm4, %v1892_v53, %v661_v30  ;;  %v670_v14 = vsel %vm2327_vm9, %v661_v30, %v1881_v50  ;;  %vm2341_vm13 = vmmov %vm2335_vm1  ;;  %v2342_v29 = vld [vmem:[#allocation13_spill] sm:$0xff] }
 0x1fd   :  { %v685_v58 = vmul.f32 %v1476_v16, %v664_v51  ;;  %v686_v9 = vmul.f32 %v1476_v16, %v670_v14  ;;  %v2329_v53 = vsel %vm1584_vm3, %v1956_v10, 0.0  ;;  %v820_v59 = vmul.f32 %v1500_v23, %v804_v47 }
 0x1fe   :  { %v644_v50 = vadd.f32 %v2329_v53, %v579_v61  ;;  %v776_v22 = vadd.f32 %v2331_v60, %v707_v6  ;;  %v777_v16 = vadd.f32 %v2030_v54, %v708_v2  ;;  %v834_v34 = vsel %vm1698_vm15, %v818_v4, 0.0 }
 0x1ff   :  { %v701_v31 = vsel %vm1693_vm14, %v685_v58, 0.0  ;;  %v702_v46 = vsel %vm1740_vm11, %v686_v9, 0.0  ;;  %v852_v10 = vpop.permute.xlu1 %851  ;;  %v798_v21 = vsel %vm2332_vm7, %v1883_v28, %v1981_v35  ;;  %v924_v8 = vadd.f32 %v2336_v62, %v908_v55 }
 0x200   :  { %v709_v26 = vadd.f32 %v701_v31, %v644_v50  ;;  %v710_v32 = vadd.f32 %v702_v46, %v645_v40  ;;  %v865_v54 = vsel %vm2333_vm8, %v852_v10, %v1909_v41  ;;  %v867_v43 = vsel %vm2335_vm1, %v2334_v17, %v852_v10  ;;  %v2345_v31 = vld [vmem:[#allocation16_spill] sm:$0xff] }
 0x201   :  { %v925_v25 = vadd.f32 %v2336_v62, %v909_v15  ;;  %v886_v18 = vmul.f32 %v2337_v56, %v867_v43  ;;  %v887_v11 = vmul.f32 %v2337_v56, %v865_v54  ;;  %v2338_v28 = vsel %vm1584_vm3, %v2006_v19, 0.0  ;;  %vm2340_vm3 = vmmov %vm2335_vm1 }
 0x202   :  { %v778_v35 = vadd.f32 %v2338_v28, %v709_v26  ;;  %v779_v3 = vadd.f32 %v771_v52, %v710_v32  ;;  %v841_v7 = vadd.f32 %v817_v39, %v776_v22  ;;  %v842_v20 = vadd.f32 %v834_v34, %v777_v16 }
 0x203   :  { %v860_v61 = vpop.permute.xlu1 %859  ;;  %v819_v45 = vmul.f32 %v1500_v23, %v798_v21  ;;  %v836_v0 = vsel %vm1759_vm10, %v820_v59, 0.0  ;;  %v902_v63 = vsel %vm1734_vm5, %v886_v18, 0.0  ;;  %v903_v57 = vsel %vm2339_vm6, %v887_v11, 0.0  ;;  %v967_v11 = vpop.permute.xlu0 %966 }
 0x204   :  { %v910_v19 = vadd.f32 %v902_v63, %v841_v7  ;;  %v911_v38 = vadd.f32 %v903_v57, %v842_v20  ;;  %v863_v52 = vsel %vm2340_vm3, %v1909_v41, %v860_v61  ;;  %v869_v23 = vsel %vm2341_vm13, %v860_v61, %v2334_v17  ;;  %v1200_v57 = vld [vmem:[#allocation2 + $0x8] sm:$0xff] }
 0x205   :  { %v932_v42 = vadd.f32 3.0, %v924_v8  ;;  %v888_v5 = vmul.f32 %v2337_v56, %v863_v52  ;;  %v889_v1 = vmul.f32 %v2337_v56, %v869_v23  ;;  %v933_v33 = vadd.f32 3.0, %v925_v25  ;;  %v1201_v23 = vld [vmem:[#allocation2 + $0x10] sm:$0xff] }
 0x206   :  { %v926_v44 = vadd.f32 %v2342_v29, %v910_v19  ;;  %v927_v48 = vadd.f32 %v2342_v29, %v911_v38  ;;  %v843_v30 = vadd.f32 %v819_v45, %v778_v35  ;;  %v844_v6 = vadd.f32 %v836_v0, %v779_v3  ;;  %v1199_v0 = vld [vmem:[#allocation2] sm:$0xff] }
 0x207   :  { %v904_v2 = vsel %vm1693_vm14, %v888_v5, 0.0  ;;  %v905_v37 = vsel %vm873_vm12, %v889_v1, 0.0  ;;  %v2343_v47 = vmax.f32 %v1924_v12, 0.0  ;;  %v940_v9 = vmax.f32 %v932_v42, 0.0  ;;  %v2346_v12 = vld [vmem:[#allocation15_spill] sm:$0xff]  ;;  %v1202_v5 = vld [vmem:[#allocation2 + $0x18] sm:$0xff] }
 0x208   :  { %v934_v41 = vadd.f32 3.0, %v926_v44  ;;  %v912_v51 = vadd.f32 %v904_v2, %v843_v30  ;;  %v913_v14 = vadd.f32 %v905_v37, %v844_v6  ;;  %v935_v4 = vadd.f32 3.0, %v927_v48 }
 0x209   :  { %v946_v58 = vmin.f32 %v2343_v47, 6.0  ;;  %v2344_v55 = vmax.f32 %v1931_v36, 0.0  ;;  %v941_v53 = vmax.f32 %v933_v33, 0.0  ;;  %v948_v16 = vmin.f32 %v940_v9, 6.0 }
 0x20a   :  { %v942_v27 = vmax.f32 %v934_v41, 0.0  ;;  %v928_v50 = vadd.f32 %v2342_v29, %v912_v51  ;;  %v929_v49 = vadd.f32 %v2342_v29, %v913_v14  ;;  %v943_v24 = vmax.f32 %v935_v4, 0.0 }
 0x20b   :  { %v947_v15 = vmin.f32 %v2344_v55, 6.0  ;;  %v954_v10 = vmul.f32 %v946_v58, %v2346_v12  ;;  %v949_v39 = vmin.f32 %v941_v53, 6.0  ;;  %v956_v56 = vmul.f32 %v948_v16, %v924_v8 }
 0x20c   :  { %v950_v13 = vmin.f32 %v942_v27, 6.0  ;;  %v936_v40 = vadd.f32 3.0, %v928_v50  ;;  %v951_v60 = vmin.f32 %v943_v24, 6.0  ;;  %v937_v22 = vadd.f32 3.0, %v929_v49 }
 0x20d   :  { %v955_v46 = vmul.f32 %v947_v15, %v2345_v31  ;;  %v957_v43 = vmul.f32 %v949_v39, %v925_v25  ;;  %vm968_vm5 = vcmask 130048  }
 0x20e   :  { %v944_v59 = vmax.f32 %v936_v40, 0.0  ;;  %v959_v36 = vmul.f32 %v951_v60, %v927_v48  ;;  %v958_v26 = vmul.f32 %v950_v13, %v926_v44  ;;  %v945_v32 = vmax.f32 %v937_v22, 0.0 }
 0x210   :  { %v952_v34 = vmin.f32 %v944_v59, 6.0  ;;  %v1143_v21 = vpack.c.bf16 %v959_v36, %v955_v46  ;;  %v1145_v54 = vpack.c.bf16 %v958_v26, %v954_v10  ;;  %v953_v17 = vmin.f32 %v945_v32, 6.0 }
 0x212   :  { %1144 = vmatprep.subr.bf16.mxu0 %v1143_v21  ;;  %v961_v62 = vmul.f32 %v953_v17, %v929_v49  ;;  %v960_v18 = vmul.f32 %v952_v34, %v928_v50 }
 0x213   :  { %1146 = vmatpush1.bf16.msra.mxu0 %v1145_v54 }
 0x214   :  { %v1147_v28 = vpack.c.bf16 %v961_v62, %v957_v43  ;;  %v1149_v35 = vpack.c.bf16 %v960_v18, %v956_v56  ;;  %v964_v3 = vpop.permute.xlu1 %963 }
 0x216   :  { %1148 = vmatprep.subr.bf16.mxu1 %v1147_v28  ;;  %1141 = vmatmul.mubr.msk.f32.vlgmr.msra.gmra.mrb[4].mxu0 %vm968_vm5, %v967_v11 }
 0x217   :  { %1150 = vmatpush1.bf16.msra.mxu1 %v1149_v35 }
 0x21a   :  { %1142 = vmatmul.mubr.msk.f32.vlgmr.msra.gmra.mrb[4].mxu1 %vm968_vm5, %v967_v11 }
 0x2e9   :  { %v1037_v7 = vpop.f32.mrb[4].mxu0 }
 0x2ea   :  { %v1038_v20 = vadd.f32 %v1037_v7, %v964_v3  ;;  %v1039_v61 = vpop.f32.mrb[5].mxu0 }
 0x2eb   :  { %v1040_v45 = vadd.f32 %v1039_v61, %v964_v3 }
 0x2ec   :  { %v1113_v63 = vadd.f32 %v1199_v0, %v1038_v20 }
 0x2ed   :  { %v1108_v25 = vpop.f32.mrb[4].mxu1  ;;  %v1114_v8 = vadd.f32 %v1200_v57, %v1040_v45 }
 0x2ee   :  { %v1109_v19 = vadd.f32 %v1108_v25, %v964_v3  ;;  %1117 = vst [vmem:[#allocation7] sm:$0xff] %v1113_v63  ;;  %v1110_v38 = vpop.f32.mrb[5].mxu1 }
 0x2ef   :  { %1118 = vst [vmem:[#allocation7 + $0x8] sm:$0xff] %v1114_v8  ;;  %v1111_v52 = vadd.f32 %v1110_v38, %v964_v3 }
 0x2f0   :  { %v1115_v42 = vadd.f32 %v1201_v23, %v1109_v19 }
 0x2f1   :  { %v1116_v1 = vadd.f32 %v1202_v5, %v1111_v52 }
 0x2f2   :  { %1119 = vst [vmem:[#allocation7 + $0x10] sm:$0xff] %v1115_v42 }
 0x2f3   :  { %1120 = vst [vmem:[#allocation7 + $0x18] sm:$0xff] %v1116_v1 }
 0x2f4   :  { %1258 = shalt.err (!%p1255_p6)
}
 0x2f5   :  { %s1259_s19 = scalar_lea.hbm %s2234_s2, 512 }
 0x2f6   :  { %p1260_p7 = scmp.ne.s32.totalorder %s2234_s2, %s1259_s19  ;;  %p1263_p8 = scmp.lt.u32.totalorder %s1259_s19, %s2234_s2 }
 0x2f8   :  { %p1265_p9 = pnand %p1263_p8, %p1260_p7 }
 0x2fa   :  { %1268 = shalt.err (!%p1265_p9)
}
 0x2fb   :  { %1130 = dma.vmem_to_hbm [thread:$0]  %s1128_s15, 512, %s2234_s2, [#allocation4]  }
 0x2fc   :  { %1273 = dma.done.wait [#allocation4], 512  }
 0x2fd   :  { %1274 = vsyncadd [#allocation4], 4294966784 }
 0x2fe   :  { %1134 = vsyncpa [#allocation3], 1 }
 0x2ff   :  { %1135 = vsyncpa [#allocation6], 1 }
 0x300   :  { %1136 = vsyncpa [#allocation4], 1 }

</bundles_post_ra>
